<compile_context>
chip_gen: v5e
topology: v5e:2x2
jax: 0.10.0
libtpu: 0.0.40
codegen_flags: <defaults>
</compile_context>

<pallas_src>
import numpy as np
import jax
import jax.numpy as jnp
from jax import lax
from jax.experimental import pallas as pl
from jax.experimental.pallas import tpu as pltpu


def _round_up(a, b):
    return ((a + b - 1) // b) * b


def _choose_tile_s(S, C, itemsize, tile_s=None, vmem_budget=16 * 1024 * 1024):
    """Pick the spatial (lane) tile: multiple of 128 (or full S), VMEM-budgeted."""
    if tile_s is None:
        sub = max(1, 32 // itemsize)              # sublanes per native tile for dtype
        x_bytes = _round_up(C, sub) * itemsize    # x tile bytes per lane (sublane-padded)
        per_lane = (x_bytes + 8 * 4) * 2          # + (1,T) i32 target; both double-buffered
        max_lanes = max(128, vmem_budget // per_lane)
        if S <= max_lanes:
            return S                              # single full-S tile (full-dim block OK)
        tile_s = (max_lanes // 128) * 128
    tile_s = int(tile_s)
    if tile_s >= S:
        return S
    # last-dim block constraint: multiple of 128 (or the full S, handled above)
    return max(128, (tile_s // 128) * 128)


def _make_kernel(C, TILE_S, S_valid, needs_mask):
    def kernel(x_ref, tgt_ref, out_ref):
        s = pl.program_id(1)

        @pl.when(s == 0)
        def _init():
            out_ref[...] = jnp.zeros_like(out_ref)

        x = x_ref[...].astype(jnp.float32)          # (C, TILE_S); cast in-kernel
        tgt = tgt_ref[...]                           # (1, TILE_S) int32

        if needs_mask:
            col = s * TILE_S + lax.broadcasted_iota(jnp.int32, (1, TILE_S), 1)
            valid = col < S_valid                    # (1, TILE_S) bool
            x = jnp.where(valid, x, 0.0)             # zero BEFORE exp -> no inf/NaN

        # softmax over the class (sublane) axis, per spatial column
        m = jnp.max(x, axis=0, keepdims=True)        # (1, TILE_S)
        e = jnp.exp(x - m)
        denom = jnp.sum(e, axis=0, keepdims=True)
        sm = e * pl.reciprocal(denom, approx=False)  # per-column reciprocal, not C*T divides

        # scatter_-style one-hot as an iota compare; never materialized in HBM
        cidx = lax.broadcasted_iota(jnp.int32, (C, TILE_S), 0)
        hit = tgt == cidx                            # (C, TILE_S) bool

        if needs_mask:
            sm = jnp.where(valid, sm, 0.0)
            hit = jnp.logical_and(hit, valid)

        inter = jnp.sum(jnp.where(hit, sm, 0.0), axis=1, keepdims=True)   # (C, 1)
        psq = jnp.sum(sm * sm, axis=1, keepdims=True)                     # (C, 1)
        gsq = jnp.sum(hit.astype(jnp.float32), axis=1, keepdims=True)     # (C, 1)

        # pack the three (C,1) partials into the resident (1, C, 3) output block
        kidx = lax.broadcasted_iota(jnp.int32, (1, C, 3), 2)
        upd = jnp.where(kidx == 0, inter[None],
                        jnp.where(kidx == 1, psq[None], gsq[None]))
        out_ref[...] = out_ref[...] + upd

    return kernel


def tanimoto_loss(x, target, smooth=1.0, tile_s=None):
    """Pallas-TPU TanimotoLoss forward.  x: (N, C, *spatial), target: (N, *spatial)."""
    n, c = int(x.shape[0]), int(x.shape[1])
    S = int(np.prod(x.shape[2:])) if x.ndim > 2 else 1

    # contiguous reshapes only -- no transpose / upcast / pad copies in HBM
    x3 = x.reshape(n, c, S)
    tgt3 = target.astype(jnp.int32).reshape(n, 1, S)

    itemsize = int(jnp.dtype(x.dtype).itemsize)
    TILE_S = _choose_tile_s(S, c, itemsize, tile_s)
    num_s_tiles = -(-S // TILE_S)
    needs_mask = (S % TILE_S) != 0

    kernel = _make_kernel(c, TILE_S, S, needs_mask)

    stats = pl.pallas_call(
        kernel,
        out_shape=jax.ShapeDtypeStruct((n, c, 3), jnp.float32),
        grid_spec=pltpu.PrefetchScalarGridSpec(
            num_scalar_prefetch=0,
            grid=(n, num_s_tiles),
            in_specs=[
                pl.BlockSpec((pl.Squeezed(), c, TILE_S), lambda b, s: (b, 0, s)),
                pl.BlockSpec((pl.Squeezed(), 1, TILE_S), lambda b, s: (b, 0, s)),
            ],
            out_specs=pl.BlockSpec((1, c, 3), lambda b, s: (b, 0, 0)),
        ),
        compiler_params=pltpu.CompilerParams(
            dimension_semantics=("parallel", "arbitrary"),
            vmem_limit_bytes=32 * 1024 * 1024,
        ),
    )(x3, tgt3)

    # tiny finalize in the wrapper: combine per-batch (and per-core) partials
    per_class = jnp.sum(stats, axis=0)               # (C, 3)
    inter = per_class[:, 0]
    psq = per_class[:, 1]
    gsq = per_class[:, 2]
    smooth = jnp.float32(smooth)
    tanimoto = (inter + smooth) / (psq + gsq - inter + smooth)
    return jnp.mean(1.0 - tanimoto)


def _reference_loss(x, target, smooth=1.0):
    """Pure-JAX replica of the PyTorch TanimotoLoss forward."""
    c = x.shape[1]
    sm = jax.nn.softmax(x.astype(jnp.float32), axis=1)
    onehot = jax.nn.one_hot(target, c, axis=1, dtype=jnp.float32)
    x_flat = jnp.moveaxis(sm, 1, 0).reshape(c, -1)
    g_flat = jnp.moveaxis(onehot, 1, 0).reshape(c, -1)
    inter = jnp.sum(x_flat * g_flat, axis=-1)
    xsq = jnp.sum(x_flat ** 2, axis=-1)
    gsq = jnp.sum(g_flat ** 2, axis=-1)
    tanimoto = (inter + smooth) / (xsq + gsq - inter + smooth)
    return jnp.mean(1.0 - tanimoto)


if __name__ == "__main__":
    key = jax.random.PRNGKey(0)

    # case 1: canonical shapes; tile_s=128 -> grid (2, 2), exercising the
    # multi-tile accumulate path and the parallel batch axis (f32 logits).
    kx, kt = jax.random.split(jax.random.fold_in(key, 0))
    n, c, h, w = 2, 4, 16, 16
    x = jax.random.normal(kx, (n, c, h, w), dtype=jnp.float32)
    target = jax.random.randint(kt, (n, h, w), 0, c, dtype=jnp.int32)

    out = jax.block_until_ready(tanimoto_loss(x, target, smooth=1.0, tile_s=128))
    ref = _reference_loss(x, target, smooth=1.0)
    assert np.allclose(np.asarray(out), np.asarray(ref), rtol=1e-5, atol=1e-6), (out, ref)

    # case 2: bf16 logits + ragged spatial tail (S=200 with 128-lane tiles),
    # exercising the native-dtype path and the in-kernel tail mask.
    kx2, kt2 = jax.random.split(jax.random.fold_in(key, 1))
    n2, c2, h2, w2 = 2, 3, 10, 20
    x2 = jax.random.normal(kx2, (n2, c2, h2, w2), dtype=jnp.float32).astype(jnp.bfloat16)
    t2 = jax.random.randint(kt2, (n2, h2, w2), 0, c2, dtype=jnp.int32)

    out2 = jax.block_until_ready(tanimoto_loss(x2, t2, smooth=1.0, tile_s=128))
    ref2 = _reference_loss(x2, t2, smooth=1.0)
    assert np.allclose(np.asarray(out2), np.asarray(ref2), rtol=1e-4, atol=1e-5), (out2, ref2)

    print("KERNEL_OK")
</pallas_src>

<mosaic_0001>
module attributes {stable_mosaic.version = 11 : i64} {
  func.func @kernel(%arg0: i32, %arg1: i32, %arg2: memref<1x4x128xf32, #tpu.memory_space<vmem>>, %arg3: memref<1x1x128xi32, #tpu.memory_space<vmem>>, %arg4: memref<1x4x3xf32, #tpu.memory_space<vmem>>) attributes {dimension_semantics = [#tpu.dimension_semantics<parallel>, #tpu.dimension_semantics<arbitrary>], iteration_bounds = array<i64: 2, 2>, scalar_prefetch = 0 : i64, scratch_operands = 0 : i64, tpu.core_type = #tpu.core_type<tc>, window_params = [{transform_indices = @transform_0, window_bounds = array<i64: 1, 4, 128>}, {transform_indices = @transform_1, window_bounds = array<i64: 1, 1, 128>}, {transform_indices = @transform_2, window_bounds = array<i64: 1, 4, 3>}]} {
    %c0_i32 = arith.constant 0 : i32
    %0 = arith.cmpi eq, %arg1, %c0_i32 : i32
    %1 = arith.extui %0 : i1 to i32
    %c0_i32_0 = arith.constant 0 : i32
    %2 = arith.cmpi ne, %1, %c0_i32_0 : i32
    scf.if %2 {
      %cst_18 = arith.constant 0.000000e+00 : f32
      %50 = vector.broadcast %cst_18 : f32 to vector<1x4x3xf32>
      %c0_19 = arith.constant 0 : index
      %c0_20 = arith.constant 0 : index
      %c0_21 = arith.constant 0 : index
      %51 = vector.load %arg4[%c0_19, %c0_20, %c0_21] : memref<1x4x3xf32, #tpu.memory_space<vmem>>, vector<1x4x3xf32>
      tpu.vector_store %arg4[%c0_19, %c0_20, %c0_21], %50 {strides = array<i32>} : memref<1x4x3xf32, #tpu.memory_space<vmem>>, vector<1x4x3xf32>,
    } else {
    }
    %c0 = arith.constant 0 : index
    %c0_1 = arith.constant 0 : index
    %c0_2 = arith.constant 0 : index
    %3 = vector.load %arg2[%c0, %c0_1, %c0_2] : memref<1x4x128xf32, #tpu.memory_space<vmem>>, vector<1x4x128xf32>
    %4 = vector.shape_cast %3 : vector<1x4x128xf32> to vector<4x128xf32>
    %c0_3 = arith.constant 0 : index
    %c0_4 = arith.constant 0 : index
    %c0_5 = arith.constant 0 : index
    %5 = vector.load %arg3[%c0_3, %c0_4, %c0_5] : memref<1x1x128xi32, #tpu.memory_space<vmem>>, vector<1x1x128xi32>
    %6 = vector.shape_cast %5 : vector<1x1x128xi32> to vector<1x128xi32>
    %cst = arith.constant dense<0xFF800000> : vector<128xf32>
    %7 = vector.multi_reduction <maximumf>, %4, %cst [0] : vector<4x128xf32> to vector<128xf32>
    %8 = vector.shape_cast %7 : vector<128xf32> to vector<1x128xf32>
    %9 = vector.broadcast %8 : vector<1x128xf32> to vector<4x128xf32>
    %10 = arith.subf %4, %9 : vector<4x128xf32>
    %11 = math.exp %10 : vector<4x128xf32>
    %cst_6 = arith.constant dense<0.000000e+00> : vector<128xf32>
    %12 = vector.multi_reduction <add>, %11, %cst_6 [0] : vector<4x128xf32> to vector<128xf32>
    %13 = vector.shape_cast %12 : vector<128xf32> to vector<1x128xf32>
    %14 = tpu.reciprocal %13 : vector<1x128xf32> -> vector<1x128xf32>
    %15 = vector.broadcast %14 : vector<1x128xf32> to vector<4x128xf32>
    %16 = arith.mulf %11, %15 : vector<4x128xf32>
    %17 = tpu.iota {dimensions = array<i32: 0>} : vector<4x128xi32>
    %18 = vector.broadcast %6 : vector<1x128xi32> to vector<4x128xi32>
    %19 = arith.cmpi eq, %18, %17 : vector<4x128xi32>
    %cst_7 = arith.constant 0.000000e+00 : f32
    %20 = vector.broadcast %cst_7 : f32 to vector<4x128xf32>
    %21 = arith.select %19, %16, %20 : vector<4x128xi1>, vector<4x128xf32>
    %cst_8 = arith.constant dense<0.000000e+00> : vector<4xf32>
    %22 = vector.multi_reduction <add>, %21, %cst_8 [1] : vector<4x128xf32> to vector<4xf32>
    %23 = vector.shape_cast %22 : vector<4xf32> to vector<4x1xf32>
    %24 = arith.mulf %16, %16 : vector<4x128xf32>
    %cst_9 = arith.constant dense<0.000000e+00> : vector<4xf32>
    %25 = vector.multi_reduction <add>, %24, %cst_9 [1] : vector<4x128xf32> to vector<4xf32>
    %26 = vector.shape_cast %25 : vector<4xf32> to vector<4x1xf32>
    %27 = arith.extui %19 : vector<4x128xi1> to vector<4x128xi32>
    %28 = arith.sitofp %27 : vector<4x128xi32> to vector<4x128xf32>
    %cst_10 = arith.constant dense<0.000000e+00> : vector<4xf32>
    %29 = vector.multi_reduction <add>, %28, %cst_10 [1] : vector<4x128xf32> to vector<4xf32>
    %30 = vector.shape_cast %29 : vector<4xf32> to vector<4x1xf32>
    %31 = tpu.iota {dimensions = array<i32: 2>} : vector<1x4x3xi32>
    %c0_i32_11 = arith.constant 0 : i32
    %32 = vector.broadcast %c0_i32_11 : i32 to vector<1x4x3xi32>
    %33 = arith.cmpi eq, %31, %32 : vector<1x4x3xi32>
    %34 = vector.shape_cast %23 : vector<4x1xf32> to vector<1x4x1xf32>
    %c1_i32 = arith.constant 1 : i32
    %35 = vector.broadcast %c1_i32 : i32 to vector<1x4x3xi32>
    %36 = arith.cmpi eq, %31, %35 : vector<1x4x3xi32>
    %37 = vector.shape_cast %26 : vector<4x1xf32> to vector<1x4x1xf32>
    %38 = vector.shape_cast %30 : vector<4x1xf32> to vector<1x4x1xf32>
    %39 = vector.shape_cast %37 : vector<1x4x1xf32> to vector<1x4x1xf32>
    %40 = vector.broadcast %39 : vector<1x4x1xf32> to vector<1x4x3xf32>
    %41 = vector.shape_cast %38 : vector<1x4x1xf32> to vector<1x4x1xf32>
    %42 = vector.broadcast %41 : vector<1x4x1xf32> to vector<1x4x3xf32>
    %43 = arith.select %36, %40, %42 : vector<1x4x3xi1>, vector<1x4x3xf32>
    %44 = vector.shape_cast %34 : vector<1x4x1xf32> to vector<1x4x1xf32>
    %45 = vector.broadcast %44 : vector<1x4x1xf32> to vector<1x4x3xf32>
    %46 = arith.select %33, %45, %43 : vector<1x4x3xi1>, vector<1x4x3xf32>
    %c0_12 = arith.constant 0 : index
    %c0_13 = arith.constant 0 : index
    %c0_14 = arith.constant 0 : index
    %47 = vector.load %arg4[%c0_12, %c0_13, %c0_14] : memref<1x4x3xf32, #tpu.memory_space<vmem>>, vector<1x4x3xf32>
    %48 = arith.addf %47, %46 : vector<1x4x3xf32>
    %c0_15 = arith.constant 0 : index
    %c0_16 = arith.constant 0 : index
    %c0_17 = arith.constant 0 : index
    %49 = vector.load %arg4[%c0_15, %c0_16, %c0_17] : memref<1x4x3xf32, #tpu.memory_space<vmem>>, vector<1x4x3xf32>
    tpu.vector_store %arg4[%c0_15, %c0_16, %c0_17], %48 {strides = array<i32>} : memref<1x4x3xf32, #tpu.memory_space<vmem>>, vector<1x4x3xf32>,
    return
  }
  func.func @transform_0(%arg0: i32, %arg1: i32) -> (i32, i32, i32) {
    %c0_i32 = arith.constant 0 : i32
    %c0_i32_0 = arith.constant 0 : i32
    return %arg0, %c0_i32, %arg1 : i32, i32, i32
  }
  func.func @transform_1(%arg0: i32, %arg1: i32) -> (i32, i32, i32) {
    %c0_i32 = arith.constant 0 : i32
    %c0_i32_0 = arith.constant 0 : i32
    return %arg0, %c0_i32, %arg1 : i32, i32, i32
  }
  func.func @transform_2(%arg0: i32, %arg1: i32) -> (i32, i32, i32) {
    %c0_i32 = arith.constant 0 : i32
    %c0_i32_0 = arith.constant 0 : i32
    %c0_i32_1 = arith.constant 0 : i32
    return %arg0, %c0_i32, %c0_i32_0 : i32, i32, i32
  }
}

</mosaic_0001>

<bundles_post_ra>
// kernel: tpu_custom_call.1
= control target key start
LH: loop header
LB: loop body
LE: loop exit
PB: predicated region body
PF: predicated region fallthrough
CT: control target
= control target key end

     0   :  { %7 = vsyncpa [#allocation3], 0  ;;  %s777_s0 = inlined_call_operand.hbm [shape: f32[2,4,256], index: 0, kind: input, shape index: {}]   ;;  %s778_s1 = inlined_call_operand.hbm [shape: s32[2,1,256], index: 1, kind: input, shape index: {}]   ;;  %s779_s2 = inlined_call_operand.vmem [shape: f32[2,4,3], index: 2, kind: output, shape index: {}]  }
   0x1   :  { %9 = vsyncpa [#allocation3 + $0x1], 0 }
   0x2   :  { %10 = vsyncpa [#allocation5], 0 }
   0x3   :  { %12 = vsyncpa [#allocation5 + $0x1], 0  ;;  %s630_s9 = smov 0   ;;  %s632_s10 = smov 0  }
   0x4   :  { %s634_s11 = smov 0   ;;  %s636_s12 = smov 0  }
   0x5   :  { %s638_s13 = smov 0   ;;  %s640_s14 = smov 0  }
   0x6   :  { %s642_s15 = smov 0   ;;  %s644_s16 = smov 0  }
   0x7 LB: > { %s383_s17 = sadd.s32 4294967295, %s611_s16   ;;  %s27_s18 = sadd.s32 1, %s603_s14  ;;  %s611_s16 = sphi %s644_s16, %s18_s16   ;;  %s607_s15 = sphi %s642_s15, %s789_s15   ;;  %s603_s14 = sphi %s640_s14, %s788_s14   ;;  %s599_s13 = sphi %s638_s13, %s787_s13   ;;  %s595_s12 = sphi %s636_s12, %s786_s12   ;;  %s591_s11 = sphi %s634_s11, %s785_s11   ;;  %s587_s10 = sphi %s632_s10, %s784_s10   ;;  %s583_s9 = sphi %s630_s9, %s783_s9  }
   0x8   : > { %p28_p0 = scmp.ge.s32.totalorder %s27_s18, 2  ;;  %s30_s19 = sadd.s32 1, %s607_s15 }
   0x9   : > { %s39_s20 = sadd.s32 1, %s591_s11  ;;  %p46_p1 = scmp.ne.s32.totalorder %s591_s11, %s587_s10 }
   0xa   : > { %s791_s18 = smov (%p28_p0, %s27_s18), 0  ;;  %s793_s19 = smov (!%p28_p0, %s30_s19), %s607_s15 }
   0xb   : > { %s35_s21 = ssub.s32 %s603_s14, %s791_s18  ;;  %p47_p2 = scmp.eq.s32.totalorder %s611_s16, 0 }
   0xc   : > { %p32_p3 = scmp.ge.s32.totalorder %s793_s19, 2  ;;  %p52_p4 = scmp.ne.s32.totalorder %s587_s10, %s583_s9 }
   0xd   : > { %p681_p5 = por %p47_p2, %p46_p1  ;;  %p53_p6 = scmp.eq.s32.totalorder %s383_s17, 0 }
   0xe   : > { %s795_s19 = smov (%p32_p3, %s793_s19), 0  ;;  %p409_p8 = scmp.lt.s32.totalorder %s611_s16, 4 }
   0xf   : > { %p687_p7 = por %p53_p6, %p52_p4  ;;  %s34_s24 = ssub.s32 %s607_s15, %s795_s19 }
  0x10   : > { %s36_s25 = sor.u32 %s35_s21, %s34_s24  ;;  %s130_s26 = sand.u32 1, %s591_s11  }
  0x11   : > { %p37_p9 = scmp.eq.s32.totalorder %s36_s25, 0  ;;  %s387_s27 = sshll.u32 %s130_s26, 2 }
  0x12   : > { %s388_s28 = sshll.u32 %s607_s15, 1  ;;  %s134_s4 = scalar_lea.vmem [#allocation2], %s387_s27 }
  0x13   : > { %s697_s29 = scalar_select %p37_p9, %s591_s11, %s39_s20  }
  0x14   : > { %s138_s30 = sadd.s32 %s603_s14, %s388_s28  ;;  %s144_s5 = sshll.u32 %s134_s4, 4  ;;  %s145_s5 = int_to_ptr.vmem [resolvable:$true] %s144_s5 }
  0x15   : > { %s389_s3 = sshll.u32 %s138_s30, 2  ;;  %p707_p10 = pnand %p409_p8, %p681_p5 }
  0x16   : > { %s140_s8 = scalar_lea.hbm %s777_s0, %s389_s3  ;;  %p391_p11 = scmp.ge.s32.totalorder %s611_s16, 1 }
  0x17   : > { %s142_s9 = sshll.u32 %s140_s8, 4  ;;  %p168_p12 = scmp.lt.s32.totalorder %s611_s16, 5  ;;  %s143_s9 = int_to_ptr.hbm [resolvable:$true] %s142_s9 }
  0x18   : > { %s131_s20 = scalar_lea.sflag [#allocation3], %s130_s26  ;;  %s159_s25 = scalar_lea.hbm %s778_s1, %s138_s30 }
  0x19   : > { %405 = dma.hbm_to_vmem [thread:$0]  (!%p707_p10), %s143_s9, 64, %s145_s5, %s131_s20  }
  0x1a   : > { %p169_p13 = pnand %p391_p11, %p168_p12  ;;  %s161_s27 = sshll.u32 %s159_s25, 4  ;;  %s162_s27 = int_to_ptr.hbm [resolvable:$true] %s161_s27 }
  0x1b   : > { %s154_s22 = scalar_lea.vmem [#allocation4], %s130_s26  ;;  %s152_s3 = scalar_lea.sflag [#allocation5], %s130_s26 }
  0x1c   : > { %s163_s28 = sshll.u32 %s154_s22, 4  ;;  %172 = sbr.rel (%p169_p13) target bundleno = 234 (0xea), region = 28  ;;  %s164_s28 = int_to_ptr.vmem [resolvable:$true] %s163_s28 }
  0x1d   : > { %408 = dma.hbm_to_vmem [thread:$0]  (!%p707_p10), %s162_s27, 16, %s164_s28, %s152_s3  }
  0x1e   : > { %s721_s4 = sand.u32 (!%p169_p13), 1, %s587_s10  }
  0x1f   : > { %s392_s5 = sshll.u32 (!%p169_p13), %s721_s4, 2  ;;  %s175_s6 = scalar_lea.sflag (!%p169_p13), [#allocation3], %s721_s4 }
  0x20   : > { %s178_s7 = scalar_lea.vmem (!%p169_p13), [#allocation2], %s392_s5 }
  0x21   : > { %574 = dma.done.wait (%p687_p7), %s175_s6, 64  }
  0x22   : > { %576 = vsyncadd (%p687_p7), %s175_s6, 4294967232  ;;  %s185_s26 = scalar_lea.sflag [#allocation5], %s721_s4  ;;  %s187_s30 = scalar_lea.vmem [#allocation4], %s721_s4 }
  0x23   : > { %578 = dma.done.wait (%p687_p7), %s185_s26, 16  }
  0x24   : > { %580 = vsyncadd (%p687_p7), %s185_s26, 4294967280  ;;  %p212_p0 = scmp.lt.s32.totalorder %s599_s13, 1  ;;  %p394_p1 = scmp.ne.s32.totalorder %s595_s12, 0 }
  0x26   : > { %s797_s13 = smov (!%p212_p0, %s599_s13), 1  ;;  %219 = sbr.rel (%p394_p1) target bundleno = 45 (0x2d), region = 40 }
  0x27   : > { %s393_s8 = sshll.u32 %s797_s13, 2 }
  0x28   : > { %s740_s20 = scalar_lea.vmem %s779_s2, %s393_s8 }
  0x2b   : > { %vm220_vm0 = vcmask 19456   ;;  %v613_v0 = vmov 0.0  }
  0x2c   : > { %221 = vst.msk [vmem:[%s740_s20] sm:$0xf] %vm220_vm0, %v613_v0 }
  0x2d PF: > { %v222_v1 = vld [vmem:[%s178_s7] sm:$0xf]  ;;  %vm224_vm1 = vcmask 1043456   ;;  %v257_v22 = vlaneseq  ;;  %v614_v37 = vmov 0.0   ;;  %vm282_vm9 = vcmask 19456  }
  0x2e   : > { %v225_v2 = vsel %vm224_vm1, %v222_v1, -inf  ;;  %v476_v28 = vld [vmem:[%s187_s30] ss:$0 sm:$0xff] }
  0x2f   : > { %v226_v3 = vrot.slane %v225_v2, 4  ;;  %v258_v27 = vshrl.u32 %v257_v22, 7  ;;  %v275_v41 = vand.u32 127, %v257_v22 }
  0x31   : > { %v227_v4 = vmax.f32 %v225_v2, %v226_v3  ;;  %vm260_vm6 = vcmp.eq.s32.totalorder %v476_v28, %v258_v27  ;;  %vm277_vm7 = vcmp.eq.s32.totalorder %v275_v41, 1  ;;  %vm276_vm8 = vcmp.eq.s32.totalorder %v275_v41, 0 }
  0x32   : > { %v395_v38 = vsel %vm260_vm6, 1.0, %v614_v37 }
  0x33   : > { %v228_v5 = vrot.slane %v227_v4, 2  ;;  %v271_v39 = vsel %vm224_vm1, %v395_v38, 0.0  ;;  %v280_v44 = vld [vmem:[%s740_s20] sm:$0xf] }
  0x35   : > { %v229_v6 = vmax.f32 %v227_v4, %v228_v5 }
  0x37   : > { %v230_v7 = vrot.slane %v229_v6, 1 }
  0x39   : > { %v231_v8 = vmax.f32 %v229_v6, %v230_v7 }
  0x3b   : > { %v232_v9 = vsub.f32 %v222_v1, %v231_v8 }
  0x3d   : > { %v233_v10 = vmul.f32 1.442695, %v232_v9 }
  0x3f   : > { %477 = vpow2.f32 %v233_v10 }
  0x45   : > { %v478_v11 = vpop.eup %477 }
  0x46   : > { %v235_v12 = vsel %vm224_vm1, %v478_v11, 0.0 }
  0x47   : > { %v236_v13 = vrot.slane %v235_v12, 4 }
  0x49   : > { %v237_v14 = vadd.f32 %v236_v13, %v235_v12 }
  0x4b   : > { %v238_v15 = vrot.slane %v237_v14, 2 }
  0x4d   : > { %v239_v16 = vadd.f32 %v238_v15, %v237_v14 }
  0x4f   : > { %v240_v17 = vrot.slane %v239_v16, 1 }
  0x51   : > { %v241_v18 = vadd.f32 %v240_v17, %v239_v16 }
  0x53   : > { %479 = vrcp.f32 %v241_v18  ;;  %v253_v21 = vand.u32 2147483648, %v241_v18  ;;  %vm247_vm2 = vweird.f32 %v241_v18  ;;  %v251_v24 = vand.u32 2147483647, %v241_v18 }
  0x55   : > { %v254_v26 = vor.u32 1.1754944e-38, %v253_v21  ;;  %vm252_vm5 = vcmp.eq.f32.partialorder %v251_v24, 8.507059e+37 }
  0x59   : > { %v480_v19 = vpop.eup %479 }
  0x5a   : > { %v243_v20 = vmul.f32 %v480_v19, %v241_v18  ;;  %vm248_vm3 = vweird.f32 %v480_v19 }
  0x5b   : > { %vm249_vm4 = vmor %vm247_vm2, %vm248_vm3 }
  0x5c   : > { %v244_v23 = vsub.f32 1.0, %v243_v20 }
  0x5e   : > { %v245_v25 = vmul.f32 %v480_v19, %v244_v23 }
  0x60   : > { %v246_v29 = vadd.f32 %v480_v19, %v245_v25 }
  0x62   : > { %v250_v30 = vsel %vm249_vm4, %v480_v19, %v246_v29 }
  0x63   : > { %v255_v31 = vsel %vm252_vm5, %v254_v26, %v250_v30 }
  0x64   : > { %v256_v32 = vmul.f32 %v478_v11, %v255_v31 }
  0x66   : > { %v265_v33 = vmul.f32 %v256_v32, %v256_v32  ;;  %v261_v34 = vsel %vm260_vm6, %v256_v32, 0.0 }
  0x67   : > { %v262_v35 = vsel %vm224_vm1, %v261_v34, 0.0 }
  0x68   : > { %v266_v36 = vsel %vm224_vm1, %v265_v33, 0.0  ;;  %263 = vadd.xlane.f32.xlu1 %v262_v35 }
  0x69   : > { %267 = vadd.xlane.f32.xlu0 %v266_v36 }
  0x71   : > { %272 = vadd.xlane.f32.xlu0 %v271_v39 }
  0xdb   : > { %v264_v42 = vpop.xlane.xlu1 %263 }
  0xdc   : > { %v268_v40 = vpop.xlane.xlu0 %267 }
  0xe4   : > { %v273_v43 = vpop.xlane.xlu0 %272 }
  0xe5   : > { %v278_v45 = vsel %vm277_vm7, %v268_v40, %v273_v43 }
  0xe6   : > { %v279_v46 = vsel %vm276_vm8, %v264_v42, %v278_v45 }
  0xe7   : > { %v281_v47 = vadd.f32 %v280_v44, %v279_v46 }
  0xe9   : > { %283 = vst.msk [vmem:[%s740_s20] sm:$0xf] %vm282_vm9, %v281_v47 }
  0xea PF: > { %s18_s16 = sadd.s32 1, %s611_s16   ;;  %s783_s9 = smov %s587_s10 }
  0xeb   : > { %p15_p2 = scmp.ge.s32.totalorder %s18_s16, 6   ;;  %s784_s10 = smov %s591_s11 }
  0xec   : > { %s785_s11 = smov %s697_s29  ;;  %s786_s12 = smov %s603_s14 }
  0xed   : > { %s787_s13 = smov %s607_s15  ;;  %s788_s14 = smov %s791_s18 }
  0xee   : > { %s789_s15 = smov %s795_s19  ;;  %17 = sbr.rel (!%p15_p2) target bundleno = 7 (0x7), region = 85 }
  0xf3   :  { %303 = vsyncpa [#allocation3], 1 }
  0xf4   :  { %305 = vsyncpa [#allocation3 + $0x1], 1 }
  0xf5   :  { %306 = vsyncpa [#allocation5], 1 }
  0xf6   :  { %308 = vsyncpa [#allocation5 + $0x1], 1 }

</bundles_post_ra>
